<compile_context>
chip_gen: v7x
topology: tpu7x:2x2x1
jax: 0.10.0
libtpu: 0.0.40
codegen_flags: <defaults>
</compile_context>

<pallas_src>
import jax
import jax.numpy as jnp
from jax import lax
from jax.experimental import pallas as pl
from jax.experimental.pallas import tpu as pltpu


def _make_resblock_kernel(nb, H, W, Cin, Cmid, Cout):
    M = nb * H              # matmul rows (one per (n, h))
    K1 = W * Cin            # lhs lanes, pass 1
    L1 = W * Cmid           # conv1 output lanes (== 128 at W=16, Cmid=8)
    Lsk = W * Cout          # skip / final output lanes
    LA = L1 + Lsk           # fused pass-1 output lanes

    def kernel(xp_ref, wA_ref, bA_ref, w2_ref, b2_ref, out_ref):
        # xp_ref : (nb, H+2, W*Cin)   H-padded, lane-dense input
        # wA_ref : (3, W*Cin, W*(Cmid+Cout))  banded [conv1 | skip] weights per kh
        # bA_ref : (1, W*(Cmid+Cout)) lane-dense [conv1-BN-shift | skip-bias]
        # w2_ref : (3, W*Cmid, W*Cout)        banded conv2 weights per kh
        # b2_ref : (1, W*Cout)
        # out_ref: (nb, H, W*Cout)
        xp = xp_ref[...]                                        # (nb, H+2, K1)

        # ---- pass 1: fused (conv1 | skip-conv) as 3 banded matmuls over kh ----
        accA = jnp.dot(xp[:, 0:H, :].reshape(M, K1), wA_ref[0],
                       preferred_element_type=jnp.float32)      # (M, LA)
        for dh in (1, 2):                                       # unrolled
            accA = accA + jnp.dot(xp[:, dh:dh + H, :].reshape(M, K1), wA_ref[dh],
                                  preferred_element_type=jnp.float32)
        accA = accA + bA_ref[...]
        y1 = jnp.maximum(accA[:, :L1], 0.0)                     # conv1 + BN + ReLU
        ysk = accA[:, L1:]                                       # skip conv + bias
        # (both slices fall on a 128-lane vreg boundary -> free)

        # ---- pass 2: conv2 + BN + ReLU.  H-halo = two zero rows (registers only,
        #      no VMEM scratch round-trip); W-halo is folded into w2's bands. ----
        y1h = y1.reshape(nb, H, L1)
        zrow = jnp.zeros((nb, 1, L1), jnp.float32)
        y1p = jnp.concatenate([zrow, y1h, zrow], axis=1)         # (nb, H+2, L1)

        acc2 = jnp.dot(y1p[:, 0:H, :].reshape(M, L1), w2_ref[0],
                       preferred_element_type=jnp.float32)       # (M, Lsk)
        for dh in (1, 2):
            acc2 = acc2 + jnp.dot(y1p[:, dh:dh + H, :].reshape(M, L1), w2_ref[dh],
                                  preferred_element_type=jnp.float32)
        y2 = jnp.maximum(acc2 + b2_ref[...], 0.0)

        # ---- residual add, lane-dense store (last dim = W*Cout = 128) ----
        out_ref[...] = (y2 + ysk).reshape(nb, H, Lsk)

    return kernel


def _conv_band_mats(w_hwio, col_scale, W):
    """Per-kh banded matrices implementing a 3x3 SAME conv's W-direction taps.

    Returns (3, W*Ci, W*Co) with entry [(wp*Ci+ci), (w*Co+co)] =
    sum_dw [wp == w+dw-1] * (w*col_scale)[kh, dw, ci, co]; out-of-range taps are
    simply absent (= zero W-padding). Built once in the wrapper (XLA glue)."""
    _, _, Ci, Co = w_hwio.shape
    ws = (w_hwio * col_scale).astype(jnp.float32)      # fold per-Co scale (BN)
    wp = jnp.arange(W)[:, None]
    wo = jnp.arange(W)[None, :]
    mats = []
    for dh in range(3):
        acc = jnp.zeros((W * Ci, W * Co), jnp.float32)
        for dw in range(3):
            band = (wp == wo + dw - 1).astype(jnp.float32)      # (W, W)
            acc = acc + jnp.kron(band, ws[dh, dw])              # block-Toeplitz
        mats.append(acc)
    return jnp.stack(mats)                                      # (3, W*Ci, W*Co)


def residual_block_pallas(x_nchw, params):
    """x_nchw: (N, Cin, H, W) float32. Returns (N, Cout, H, W) float32."""
    (w1, g1, be1, m1, v1,
     w2, g2, be2, m2, v2,
     wsk, bsk) = params
    eps = 1e-5

    N, Cin, H, W = x_nchw.shape
    Cmid = w1.shape[-1]
    Cout = w2.shape[-1]

    # ---- glue: lane-dense layout (C folded with W into lanes), H halo only ----
    x = jnp.transpose(x_nchw, (0, 2, 3, 1)).astype(jnp.float32)    # NHWC
    xh = jnp.pad(x, ((0, 0), (1, 1), (0, 0), (0, 0)))              # pad H by 1
    xh = xh.reshape(N, H + 2, W * Cin)                             # lane = w*Cin+ci

    # ---- BN (eval) folding + banded block-Toeplitz conv matrices ----
    inv1 = g1 / jnp.sqrt(v1 + eps)                                 # (Cmid,)
    inv2 = g2 / jnp.sqrt(v2 + eps)                                 # (Cout,)
    b1v = be1 - m1 * inv1
    b2v = be2 - m2 * inv2

    BA = jnp.concatenate([_conv_band_mats(w1, inv1, W),            # conv1 (BN folded)
                          _conv_band_mats(wsk, 1.0, W)],           # skip conv
                         axis=-1)                                  # (3, W*Cin, W*(Cmid+Cout))
    B2 = _conv_band_mats(w2, inv2, W)                              # (3, W*Cmid, W*Cout)
    bA = jnp.concatenate([jnp.tile(b1v, W),
                          jnp.tile(bsk, W)]).reshape(1, W * (Cmid + Cout))
    b2r = jnp.tile(b2v, W).reshape(1, W * Cout)

    # Grid: split the batch into >=2 "parallel" steps when possible so a v7x
    # megacore (2 TCs) can shard it; extra per-step overhead on v5e/v6e ~0.35us.
    # TODO(synk): for large H/W/C also tile H (1-row halo) to respect v7x's
    #             64 MiB VMEM; at these sizes everything is << 1 MiB.
    n_steps = 2 if (N >= 2 and N % 2 == 0) else 1
    nb = N // n_steps

    full = lambda a: pl.BlockSpec(a.shape, lambda n, _nd=a.ndim: (0,) * _nd)

    out = pl.pallas_call(
        _make_resblock_kernel(nb, H, W, Cin, Cmid, Cout),
        out_shape=jax.ShapeDtypeStruct((N, H, W * Cout), jnp.float32),
        grid_spec=pltpu.PrefetchScalarGridSpec(
            num_scalar_prefetch=0,
            grid=(n_steps,),
            in_specs=[
                pl.BlockSpec((nb, H + 2, W * Cin), lambda n: (n, 0, 0)),
                full(BA), full(bA), full(B2), full(b2r),
            ],
            out_specs=pl.BlockSpec((nb, H, W * Cout), lambda n: (n, 0, 0)),
        ),
        compiler_params=pltpu.CompilerParams(
            dimension_semantics=("parallel",)),
    )(xh, BA, bA, B2, b2r)

    out_nhwc = out.reshape(N, H, W, Cout)
    return jnp.transpose(out_nhwc, (0, 3, 1, 2))                   # back to NCHW


# --- pure-JAX reference (for correctness check) ---
def residual_block_ref(x_nchw, params):
    (w1, g1, be1, m1, v1,
     w2, g2, be2, m2, v2,
     wsk, bsk) = params
    eps = 1e-5
    x = jnp.transpose(x_nchw, (0, 2, 3, 1)).astype(jnp.float32)

    def conv(h, w_hwio):
        return lax.conv_general_dilated(
            h, w_hwio, (1, 1), "SAME",
            dimension_numbers=("NHWC", "HWIO", "NHWC"))

    def bn_relu(h, g, b, m, v):
        return jnp.maximum((h - m) / jnp.sqrt(v + eps) * g + b, 0.0)

    y = bn_relu(conv(x, w1), g1, be1, m1, v1)
    y = bn_relu(conv(y, w2), g2, be2, m2, v2)
    sk = conv(x, wsk) + bsk
    return jnp.transpose(y + sk, (0, 3, 1, 2))


def make_params(key, Cin, Cout):
    ks = jax.random.split(key, 8)
    w1 = 0.1 * jax.random.normal(ks[0], (3, 3, Cin, Cout), jnp.float32)
    w2 = 0.1 * jax.random.normal(ks[1], (3, 3, Cout, Cout), jnp.float32)
    wsk = 0.1 * jax.random.normal(ks[2], (3, 3, Cin, Cout), jnp.float32)
    bsk = 0.1 * jax.random.normal(ks[3], (Cout,), jnp.float32)
    g1 = 1.0 + 0.1 * jax.random.normal(ks[4], (Cout,), jnp.float32)
    be1 = 0.1 * jax.random.normal(ks[5], (Cout,), jnp.float32)
    m1 = 0.05 * jax.random.normal(ks[6], (Cout,), jnp.float32)
    v1 = jax.random.uniform(ks[7], (Cout,), jnp.float32, 0.5, 1.5)
    g2 = 1.0 - 0.05 * jax.random.normal(ks[4], (Cout,), jnp.float32)
    be2 = 0.05 * jax.random.normal(ks[5], (Cout,), jnp.float32)
    m2 = 0.02 * jax.random.normal(ks[6], (Cout,), jnp.float32)
    v2 = jax.random.uniform(ks[3], (Cout,), jnp.float32, 0.5, 1.5)
    return (w1, g1, be1, m1, v1, w2, g2, be2, m2, v2, wsk, bsk)


if __name__ == "__main__":
    key = jax.random.PRNGKey(0)
    kx, kp = jax.random.split(key)

    N, Cin, Cout, H, W = 2, 4, 8, 16, 16
    x = jax.random.normal(kx, (N, Cin, H, W), jnp.float32)   # NCHW like PyTorch
    params = make_params(kp, Cin, Cout)

    out = jax.block_until_ready(residual_block_pallas(x, params))
    ref = jax.block_until_ready(residual_block_ref(x, params))

    assert out.shape == (N, Cout, H, W)
    assert jnp.allclose(out, ref, atol=1e-4, rtol=1e-4), \
        f"max abs err {jnp.max(jnp.abs(out - ref))}"
    print("KERNEL_OK")
</pallas_src>

<mosaic_0001>
module attributes {stable_mosaic.version = 11 : i64} {
  func.func @kernel(%arg0: i32, %arg1: memref<1x18x64xf32, #tpu.memory_space<vmem>>, %arg2: memref<3x64x256xf32, #tpu.memory_space<vmem>>, %arg3: memref<1x256xf32, #tpu.memory_space<vmem>>, %arg4: memref<3x128x128xf32, #tpu.memory_space<vmem>>, %arg5: memref<1x128xf32, #tpu.memory_space<vmem>>, %arg6: memref<1x16x128xf32, #tpu.memory_space<vmem>>) attributes {dimension_semantics = [#tpu.dimension_semantics<parallel>], iteration_bounds = array<i64: 2>, scalar_prefetch = 0 : i64, scratch_operands = 0 : i64, tpu.core_type = #tpu.core_type<tc>, window_params = [{transform_indices = @transform_0, window_bounds = array<i64: 1, 18, 64>}, {pipeline_mode = #tpu.pipeline_mode<synchronous>, transform_indices = @transform_1, window_bounds = array<i64: 3, 64, 256>}, {pipeline_mode = #tpu.pipeline_mode<synchronous>, transform_indices = @transform_2, window_bounds = array<i64: 1, 256>}, {pipeline_mode = #tpu.pipeline_mode<synchronous>, transform_indices = @transform_3, window_bounds = array<i64: 3, 128, 128>}, {pipeline_mode = #tpu.pipeline_mode<synchronous>, transform_indices = @transform_4, window_bounds = array<i64: 1, 128>}, {transform_indices = @transform_5, window_bounds = array<i64: 1, 16, 128>}]} {
    %c0 = arith.constant 0 : index
    %c0_0 = arith.constant 0 : index
    %c0_1 = arith.constant 0 : index
    %0 = vector.load %arg1[%c0, %c0_0, %c0_1] : memref<1x18x64xf32, #tpu.memory_space<vmem>>, vector<1x18x64xf32>
    %1 = vector.extract_strided_slice %0 {offsets = [0, 0, 0], sizes = [1, 16, 64], strides = [1, 1, 1]} : vector<1x18x64xf32> to vector<1x16x64xf32>
    %2 = vector.shape_cast %1 : vector<1x16x64xf32> to vector<16x64xf32>
    %c0_2 = arith.constant 0 : index
    %c0_3 = arith.constant 0 : index
    %c0_4 = arith.constant 0 : index
    %3 = vector.load %arg2[%c0_2, %c0_3, %c0_4] : memref<3x64x256xf32, #tpu.memory_space<vmem>>, vector<1x64x256xf32>
    %4 = vector.shape_cast %3 : vector<1x64x256xf32> to vector<64x256xf32>
    %cst = arith.constant dense<0.000000e+00> : vector<16x256xf32>
    %5 = tpu.matmul %2, %4, %cst {dimension_numbers = #tpu.dot_dimension_numbers<[1], [0], [0], [1], [0, 0, 1, 1], [], []>} : vector<16x64xf32>, vector<64x256xf32>, vector<16x256xf32> -> vector<16x256xf32>
    %6 = vector.extract_strided_slice %0 {offsets = [0, 1, 0], sizes = [1, 16, 64], strides = [1, 1, 1]} : vector<1x18x64xf32> to vector<1x16x64xf32>
    %7 = vector.shape_cast %6 : vector<1x16x64xf32> to vector<16x64xf32>
    %c1 = arith.constant 1 : index
    %c0_5 = arith.constant 0 : index
    %c0_6 = arith.constant 0 : index
    %8 = vector.load %arg2[%c1, %c0_5, %c0_6] : memref<3x64x256xf32, #tpu.memory_space<vmem>>, vector<1x64x256xf32>
    %9 = vector.shape_cast %8 : vector<1x64x256xf32> to vector<64x256xf32>
    %cst_7 = arith.constant dense<0.000000e+00> : vector<16x256xf32>
    %10 = tpu.matmul %7, %9, %cst_7 {dimension_numbers = #tpu.dot_dimension_numbers<[1], [0], [0], [1], [0, 0, 1, 1], [], []>} : vector<16x64xf32>, vector<64x256xf32>, vector<16x256xf32> -> vector<16x256xf32>
    %11 = arith.addf %5, %10 : vector<16x256xf32>
    %12 = vector.extract_strided_slice %0 {offsets = [0, 2, 0], sizes = [1, 16, 64], strides = [1, 1, 1]} : vector<1x18x64xf32> to vector<1x16x64xf32>
    %13 = vector.shape_cast %12 : vector<1x16x64xf32> to vector<16x64xf32>
    %c2 = arith.constant 2 : index
    %c0_8 = arith.constant 0 : index
    %c0_9 = arith.constant 0 : index
    %14 = vector.load %arg2[%c2, %c0_8, %c0_9] : memref<3x64x256xf32, #tpu.memory_space<vmem>>, vector<1x64x256xf32>
    %15 = vector.shape_cast %14 : vector<1x64x256xf32> to vector<64x256xf32>
    %cst_10 = arith.constant dense<0.000000e+00> : vector<16x256xf32>
    %16 = tpu.matmul %13, %15, %cst_10 {dimension_numbers = #tpu.dot_dimension_numbers<[1], [0], [0], [1], [0, 0, 1, 1], [], []>} : vector<16x64xf32>, vector<64x256xf32>, vector<16x256xf32> -> vector<16x256xf32>
    %17 = arith.addf %11, %16 : vector<16x256xf32>
    %c0_11 = arith.constant 0 : index
    %c0_12 = arith.constant 0 : index
    %18 = vector.load %arg3[%c0_11, %c0_12] : memref<1x256xf32, #tpu.memory_space<vmem>>, vector<1x256xf32>
    %19 = vector.broadcast %18 : vector<1x256xf32> to vector<16x256xf32>
    %20 = arith.addf %17, %19 : vector<16x256xf32>
    %21 = vector.extract_strided_slice %20 {offsets = [0, 0], sizes = [16, 128], strides = [1, 1]} : vector<16x256xf32> to vector<16x128xf32>
    %cst_13 = arith.constant 0.000000e+00 : f32
    %22 = vector.broadcast %cst_13 : f32 to vector<16x128xf32>
    %23 = arith.maximumf %21, %22 : vector<16x128xf32>
    %24 = vector.extract_strided_slice %20 {offsets = [0, 128], sizes = [16, 128], strides = [1, 1]} : vector<16x256xf32> to vector<16x128xf32>
    %25 = vector.shape_cast %23 : vector<16x128xf32> to vector<1x16x128xf32>
    %cst_14 = arith.constant 0.000000e+00 : f32
    %26 = vector.broadcast %cst_14 : f32 to vector<1x1x128xf32>
    %27 = tpu.concatenate %26, %25, %26 in 1 : vector<1x1x128xf32>, vector<1x16x128xf32>, vector<1x1x128xf32> -> vector<1x18x128xf32>
    %28 = vector.extract_strided_slice %27 {offsets = [0, 0, 0], sizes = [1, 16, 128], strides = [1, 1, 1]} : vector<1x18x128xf32> to vector<1x16x128xf32>
    %29 = vector.shape_cast %28 : vector<1x16x128xf32> to vector<16x128xf32>
    %c0_15 = arith.constant 0 : index
    %c0_16 = arith.constant 0 : index
    %c0_17 = arith.constant 0 : index
    %30 = vector.load %arg4[%c0_15, %c0_16, %c0_17] : memref<3x128x128xf32, #tpu.memory_space<vmem>>, vector<1x128x128xf32>
    %31 = vector.shape_cast %30 : vector<1x128x128xf32> to vector<128x128xf32>
    %cst_18 = arith.constant dense<0.000000e+00> : vector<16x128xf32>
    %32 = tpu.matmul %29, %31, %cst_18 {dimension_numbers = #tpu.dot_dimension_numbers<[1], [0], [0], [1], [0, 0, 1, 1], [], []>} : vector<16x128xf32>, vector<128x128xf32>, vector<16x128xf32> -> vector<16x128xf32>
    %33 = vector.extract_strided_slice %27 {offsets = [0, 1, 0], sizes = [1, 16, 128], strides = [1, 1, 1]} : vector<1x18x128xf32> to vector<1x16x128xf32>
    %34 = vector.shape_cast %33 : vector<1x16x128xf32> to vector<16x128xf32>
    %c1_19 = arith.constant 1 : index
    %c0_20 = arith.constant 0 : index
    %c0_21 = arith.constant 0 : index
    %35 = vector.load %arg4[%c1_19, %c0_20, %c0_21] : memref<3x128x128xf32, #tpu.memory_space<vmem>>, vector<1x128x128xf32>
    %36 = vector.shape_cast %35 : vector<1x128x128xf32> to vector<128x128xf32>
    %cst_22 = arith.constant dense<0.000000e+00> : vector<16x128xf32>
    %37 = tpu.matmul %34, %36, %cst_22 {dimension_numbers = #tpu.dot_dimension_numbers<[1], [0], [0], [1], [0, 0, 1, 1], [], []>} : vector<16x128xf32>, vector<128x128xf32>, vector<16x128xf32> -> vector<16x128xf32>
    %38 = arith.addf %32, %37 : vector<16x128xf32>
    %39 = vector.extract_strided_slice %27 {offsets = [0, 2, 0], sizes = [1, 16, 128], strides = [1, 1, 1]} : vector<1x18x128xf32> to vector<1x16x128xf32>
    %40 = vector.shape_cast %39 : vector<1x16x128xf32> to vector<16x128xf32>
    %c2_23 = arith.constant 2 : index
    %c0_24 = arith.constant 0 : index
    %c0_25 = arith.constant 0 : index
    %41 = vector.load %arg4[%c2_23, %c0_24, %c0_25] : memref<3x128x128xf32, #tpu.memory_space<vmem>>, vector<1x128x128xf32>
    %42 = vector.shape_cast %41 : vector<1x128x128xf32> to vector<128x128xf32>
    %cst_26 = arith.constant dense<0.000000e+00> : vector<16x128xf32>
    %43 = tpu.matmul %40, %42, %cst_26 {dimension_numbers = #tpu.dot_dimension_numbers<[1], [0], [0], [1], [0, 0, 1, 1], [], []>} : vector<16x128xf32>, vector<128x128xf32>, vector<16x128xf32> -> vector<16x128xf32>
    %44 = arith.addf %38, %43 : vector<16x128xf32>
    %c0_27 = arith.constant 0 : index
    %c0_28 = arith.constant 0 : index
    %45 = vector.load %arg5[%c0_27, %c0_28] : memref<1x128xf32, #tpu.memory_space<vmem>>, vector<1x128xf32>
    %46 = vector.broadcast %45 : vector<1x128xf32> to vector<16x128xf32>
    %47 = arith.addf %44, %46 : vector<16x128xf32>
    %cst_29 = arith.constant 0.000000e+00 : f32
    %48 = vector.broadcast %cst_29 : f32 to vector<16x128xf32>
    %49 = arith.maximumf %47, %48 : vector<16x128xf32>
    %50 = arith.addf %49, %24 : vector<16x128xf32>
    %51 = vector.shape_cast %50 : vector<16x128xf32> to vector<1x16x128xf32>
    %c0_30 = arith.constant 0 : index
    %c0_31 = arith.constant 0 : index
    %c0_32 = arith.constant 0 : index
    %52 = vector.load %arg6[%c0_30, %c0_31, %c0_32] : memref<1x16x128xf32, #tpu.memory_space<vmem>>, vector<1x16x128xf32>
    tpu.vector_store %arg6[%c0_30, %c0_31, %c0_32], %51 {strides = array<i32>} : memref<1x16x128xf32, #tpu.memory_space<vmem>>, vector<1x16x128xf32>,
    return
  }
  func.func @transform_0(%arg0: i32) -> (i32, i32, i32) {
    %c0_i32 = arith.constant 0 : i32
    %c0_i32_0 = arith.constant 0 : i32
    %c0_i32_1 = arith.constant 0 : i32
    return %arg0, %c0_i32, %c0_i32_0 : i32, i32, i32
  }
  func.func @transform_1(%arg0: i32) -> (i32, i32, i32) {
    %c0_i32 = arith.constant 0 : i32
    %c0_i32_0 = arith.constant 0 : i32
    %c0_i32_1 = arith.constant 0 : i32
    %c0_i32_2 = arith.constant 0 : i32
    return %c0_i32, %c0_i32_0, %c0_i32_1 : i32, i32, i32
  }
  func.func @transform_2(%arg0: i32) -> (i32, i32) {
    %c0_i32 = arith.constant 0 : i32
    %c0_i32_0 = arith.constant 0 : i32
    %c0_i32_1 = arith.constant 0 : i32
    return %c0_i32, %c0_i32_0 : i32, i32
  }
  func.func @transform_3(%arg0: i32) -> (i32, i32, i32) {
    %c0_i32 = arith.constant 0 : i32
    %c0_i32_0 = arith.constant 0 : i32
    %c0_i32_1 = arith.constant 0 : i32
    %c0_i32_2 = arith.constant 0 : i32
    return %c0_i32, %c0_i32_0, %c0_i32_1 : i32, i32, i32
  }
  func.func @transform_4(%arg0: i32) -> (i32, i32) {
    %c0_i32 = arith.constant 0 : i32
    %c0_i32_0 = arith.constant 0 : i32
    %c0_i32_1 = arith.constant 0 : i32
    return %c0_i32, %c0_i32_0 : i32, i32
  }
  func.func @transform_5(%arg0: i32) -> (i32, i32, i32) {
    %c0_i32 = arith.constant 0 : i32
    %c0_i32_0 = arith.constant 0 : i32
    %c0_i32_1 = arith.constant 0 : i32
    return %arg0, %c0_i32, %c0_i32_0 : i32, i32, i32
  }
}

</mosaic_0001>

<bundles_post_ra>
// kernel: tpu_custom_call.1
= control target key start
LH: loop header
LB: loop body
LE: loop exit
PB: predicated region body
PF: predicated region fallthrough
CT: control target
= control target key end

     0   :  { %10 = vsyncpa [#allocation3], 0  ;;  %s1805_s0 = inlined_call_operand.vmem [shape: f32[2,18,64], index: 0, kind: input, shape index: {}]   ;;  %s1806_s1 = inlined_call_operand.hbm [shape: f32[3,64,256], index: 1, kind: input, shape index: {}]   ;;  %s1807_s2 = inlined_call_operand.vmem [shape: f32[1,256], index: 2, kind: input, shape index: {}]   ;;  %s1808_s3 = inlined_call_operand.hbm [shape: f32[3,128,128], index: 3, kind: input, shape index: {}]   ;;  %s1809_s4 = inlined_call_operand.vmem [shape: f32[1,128], index: 4, kind: input, shape index: {}]   ;;  %s1810_s5 = inlined_call_operand.hbm [shape: f32[2,16,128], index: 5, kind: output, shape index: {}]  }
   0x1   :  { %11 = vsyncpa [#allocation6], 0 }
   0x2   :  { %12 = vsyncpa [#allocation4], 0 }
   0x3   :  { %14 = vsyncpa [#allocation4 + $0x1], 0  ;;  %s1580_s18 = smov 0   ;;  %s1582_s19 = smov 0  }
   0x4   :  { %s1584_s20 = smov 0   ;;  %s1586_s21 = smov 0  }
   0x5 LB: > { %s1601_s22 = sadd.s32 4294967295, %s1538_s21   ;;  %s1004_s23 = sadd.s32 4294967294, %s1538_s21   ;;  %s1538_s21 = sphi %s1586_s21, %s1828_s21   ;;  %s1534_s20 = sphi %s1584_s20, %s1827_s20   ;;  %s1530_s19 = sphi %s1582_s19, %s1826_s19   ;;  %s1526_s18 = sphi %s1580_s18, %s1825_s18  }
   0x6   : > { %s1605_s24 = sadd.s32 1, %s1538_s21   ;;  %s137_s25 = sadd.s32 1, %s1534_s20 }
   0x7   : > { %s134_s26 = ssub.s32 %s1538_s21, %s1605_s24  ;;  %p147_p0 = scmp.ne.s32.totalorder %s1534_s20, %s1530_s19 }
   0x8   : > { %p135_p1 = scmp.eq.s32.totalorder %s134_s26, 0  ;;  %p148_p2 = scmp.eq.s32.totalorder %s1601_s22, 1 }
   0x9   : > { %p153_p3 = scmp.ne.s32.totalorder %s1530_s19, %s1526_s18  ;;  %p154_p4 = scmp.eq.s32.totalorder %s1004_s23, 1 }
   0xa   : > { %s1616_s27 = scalar_select %p135_p1, %s1534_s20, %s137_s25  }
   0xb   : > { %p1618_p5 = por %p148_p2, %p147_p0  ;;  %p1622_p6 = por %p154_p4, %p153_p3 }
   0xc   : > { %p1005_p7 = scmp.ge.s32.totalorder %s1538_s21, 1  ;;  %p161_p8 = scmp.lt.s32.totalorder %s1538_s21, 3 }
   0xd   : > { %s1814_s28 = scalar_select %p1618_p5, 1, 0 }
   0xe   : > { %s1815_s29 = scalar_select %p1622_p6, 1, 0 }
   0xf   : > { %p1811_p9 = scmp.eq.s32.totalorder %s1601_s22, 0  ;;  %p1629_p10 = pnand %p1005_p7, %p161_p8 }
  0x10   : > { %s1540_s6 = smov [#allocation2]   ;;  %s1541_s9 = smov [#allocation5]  }
  0x11   : > { %s1816_s30 = scalar_select %p1629_p10, 1, 0 }
  0x12   : > { %s173_s7 = sshll.u32 %s1540_s6, 4  ;;  %p1355_p11 = pneg %p1629_p10  ;;  %s174_s7 = int_to_ptr.vmem [resolvable:$true] %s173_s7 }
  0x13   : > { %s189_s10 = sshll.u32 %s1541_s9, 4  ;;  %s1412_s13 = scalar_lea.hbm %s1806_s1, 6144  ;;  %s1641_s10 = int_to_ptr.vmem [resolvable:$true] %s189_s10 }
  0x14   : > { %p1637_p12 = pnand %p1811_p9, %p1355_p11  ;;  %p1413_p13 = scmp.ne.s32.totalorder %s1806_s1, %s1412_s13 }
  0x15   : > { %p1419_p3 = scmp.lt.u32.totalorder %s1412_s13, %s1806_s1 }
  0x16   : > { %p1414_p0 = pneg %p1637_p12 }
  0x18   : > { %p1415_p1 = pnand %p1414_p0, %p1413_p13 }
  0x1a   : > { %p1416_p2 = pneg %p1415_p1 }
  0x1c   : > { %p1421_p4 = pnand %p1419_p3, %p1416_p2 }
  0x1e   : > { %1424 = shalt.err (!%p1421_p4)
}
  0x1f   : > { %s1425_s23 = scalar_lea.vmem %s174_s7, 6144  ;;  %p1433_p9 = scmp.lt.s32.totalorder %s174_s7, %s174_s7 }
  0x20   : > { %p1426_p7 = scmp.ne.s32.totalorder %s174_s7, %s1425_s23  ;;  %p1434_p6 = scmp.lt.s32.totalorder %s1425_s23, %s1425_s23 }
  0x22   : > { %p1428_p8 = pnand %p1426_p7, %p1414_p0  ;;  %p1435_p5 = por %p1434_p6, %p1433_p9 }
  0x24   : > { %p1429_p11 = pneg %p1428_p8 }
  0x26   : > { %p1436_p10 = pnand %p1435_p5, %p1429_p11 }
  0x28   : > { %1439 = shalt.err (!%p1436_p10)
}
  0x29   : > { %s1542_s25 = smov 256   ;;  %s1543_s26 = smov 16  }
  0x2a   : > { %1358 = dma.hbm_to_vmem [thread:$0]  (!%p1637_p12), %s1806_s1, 6144, %s174_s7, [#allocation3], %s1542_s25, %s1542_s25, %s1543_s26  }
  0x2b   : > { %s1440_s13 = scalar_lea.hbm %s1808_s3, 6144 }
  0x2c   : > { %p1441_p13 = scmp.ne.s32.totalorder %s1808_s3, %s1440_s13  ;;  %p1447_p9 = scmp.lt.u32.totalorder %s1440_s13, %s1808_s3 }
  0x2e   : > { %p1443_p5 = pnand %p1441_p13, %p1414_p0 }
  0x30   : > { %p1444_p6 = pneg %p1443_p5 }
  0x32   : > { %p1449_p10 = pnand %p1447_p9, %p1444_p6 }
  0x34   : > { %1452 = shalt.err (!%p1449_p10)
}
  0x35   : > { %s1453_s7 = scalar_lea.vmem %s1641_s10, 6144  ;;  %p1461_p4 = scmp.lt.s32.totalorder %s1641_s10, %s1641_s10 }
  0x36   : > { %p1454_p1 = scmp.ne.s32.totalorder %s1641_s10, %s1453_s7  ;;  %p1462_p7 = scmp.lt.s32.totalorder %s1453_s7, %s1453_s7 }
  0x38   : > { %p1456_p2 = pnand %p1454_p1, %p1414_p0  ;;  %p1463_p8 = por %p1462_p7, %p1461_p4 }
  0x3a   : > { %p1457_p3 = pneg %p1456_p2 }
  0x3c   : > { %p1464_p11 = pnand %p1463_p8, %p1457_p3 }
  0x3e   : > { %1467 = shalt.err (!%p1464_p11)
}
  0x3f   : > { %s1544_s23 = smov 128   ;;  %s1545_s25 = smov 8  }
  0x40   : > { %1361 = dma.hbm_to_vmem [thread:$0]  (!%p1637_p12), %s1808_s3, 6144, %s1641_s10, [#allocation6], %s1544_s23, %s1544_s23, %s1545_s25  }
  0x41   : > { %p1818_p13 = scmp.ne.s32.totalorder %s1816_s30, 0 }
  0x42   : > { %p1819_p0 = scmp.eq.s32.totalorder (!%p1818_p13), %s1601_s22, 0 }
  0x43   : > { %216 = sbr.rel (%p1818_p13) target bundleno = 620 (0x26c), region = 40 }
  0x4a   : > { %1513 = dma.done.wait (%p1819_p0), [#allocation3], 6144   ;;  %p1820_p5 = pmov %p1819_p0 }
  0x4b   : > { %p1821_p6 = pmov %p1819_p0 }
  0x4c   : > { %1515 = vsyncadd (%p1820_p5), [#allocation3], 4294961152 }
  0x4d   : > { %1517 = dma.done.wait (%p1821_p6), [#allocation6], 6144   ;;  %p1822_p9 = pmov %p1819_p0 }
  0x4e   : > { %v1546_v0 = vmov 0.0   ;;  %p248_p12 = scmp.lt.s32.totalorder %s1601_s22, 1  ;;  %v274_v1 = vld [vmem:[#allocation2 + $0x88] sm:$0xff]  ;;  %v276_v2 = vld [vmem:[#allocation2 + $0x98] sm:$0xff]  ;;  %v273_v3 = vld [vmem:[#allocation2 + $0x80] sm:$0xff]  ;;  %vm292_vm0 = vcmask 1046528  }
  0x4f   : > { %1519 = vsyncadd (%p1822_p9), [#allocation6], 4294961152  ;;  %367 = vmatprep.mubr.f32.mxu0 %v1546_v0  ;;  %v1188_v4 = vpack.c.bf16 %v276_v2, %v274_v1  ;;  %v275_v5 = vld [vmem:[#allocation2 + $0x90] sm:$0xff]  ;;  %v278_v6 = vld [vmem:[#allocation2 + $0xa8] sm:$0xff]  ;;  %vm298_vm1 = vcmask 523264   ;;  %vm478_vm2 = vcmask 1045504  }
  0x50   : > { %s249_s30 = scalar_select %p248_p12, %s1601_s22, 1  ;;  %v280_v7 = vld [vmem:[#allocation2 + $0xb8] sm:$0xff]  ;;  %v1190_v8 = vpack.c.bf16 %v275_v5, %v273_v3  ;;  %v277_v10 = vld [vmem:[#allocation2 + $0xa0] sm:$0xff]  ;;  %v279_v11 = vld [vmem:[#allocation2 + $0xb0] sm:$0xff]  ;;  %vm589_vm3 = vcmask 1040384  }
  0x51   : > { %v1192_v9 = vpack.c.bf16 %v280_v7, %v278_v6  ;;  %v282_v12 = vld [vmem:[#allocation2 + $0xc8] sm:$0xff]  ;;  %1189 = vmatprep.subr.bf16.mxu0 %v1188_v4  ;;  %v284_v13 = vld [vmem:[#allocation2 + $0xd8] sm:$0xff]  ;;  %v1194_v14 = vpack.c.bf16 %v279_v11, %v277_v10  ;;  %v281_v16 = vld [vmem:[#allocation2 + $0xc0] sm:$0xff]  ;;  %s245_s14 = sand.u32 1, %s1530_s19   ;;  %s1028_s25 = sshll.u32 %s1601_s22, 8 }
  0x52   : > { %s1344_s8 = smul.u32 24, %s249_s30  ;;  %1191 = vmatpush1.bf16.msra.mxu0 %v1190_v8  ;;  %v1196_v15 = vpack.c.bf16 %v284_v13, %v282_v12  ;;  %v283_v17 = vld [vmem:[#allocation2 + $0xd0] sm:$0xff]  ;;  %v286_v18 = vld [vmem:[#allocation2 + $0xe8] sm:$0xff]  ;;  %v288_v19 = vld [vmem:[#allocation2 + $0xf8] sm:$0xff]  ;;  %s1012_s15 = sshll.u32 %s245_s14, 4 }
  0x53   : > { %1193 = vmatprep.subr.bf16.mxu0 %v1192_v9  ;;  %v1198_v20 = vpack.c.bf16 %v283_v17, %v281_v16  ;;  %v285_v21 = vld [vmem:[#allocation2 + $0xe0] sm:$0xff]  ;;  %v1200_v22 = vpack.c.bf16 %v288_v19, %v286_v18  ;;  %v287_v23 = vld [vmem:[#allocation2 + $0xf0] sm:$0xff]  ;;  %v257_v26 = vld [vmem:[#allocation2 + $0x8] sm:$0xff]  ;;  %s247_s7 = scalar_lea.vmem [#allocation7], %s1012_s15  ;;  %s1761_s30 = scalar_lea.hbm %s1810_s5, %s1028_s25 }
  0x54   : > { %s252_s11 = scalar_lea.vmem %s1805_s0, %s1344_s8  ;;  %v259_v27 = vld [vmem:[#allocation2 + $0x18] sm:$0xff]  ;;  %v1202_v28 = vpack.c.bf16 %v287_v23, %v285_v21  ;;  %v256_v32 = vld [vmem:[#allocation2] sm:$0xff]  ;;  %v258_v33 = vld [vmem:[#allocation2 + $0x10] sm:$0xff]  ;;  %s920_s23 = sshll.u32 %s247_s7, 4  ;;  %s1756_s23 = int_to_ptr.vmem [resolvable:$true] %s920_s23 }
  0x55   : > { %v1706_v24 = vld [vmem:[%s252_s11] sm:$0xff]  ;;  %v1708_v25 = vld [vmem:[%s252_s11 + $0x8] sm:$0xff]  ;;  %v1204_v31 = vpack.c.bf16 %v259_v27, %v257_v26  ;;  %v1712_v34 = vld [vmem:[%s252_s11 + $0x10] sm:$0x3]  ;;  %v1206_v38 = vpack.c.bf16 %v258_v33, %v256_v32  ;;  %s1764_s8 = scalar_lea.sflag [#allocation4], %s245_s14  ;;  %s1468_s22 = scalar_lea.vmem %s1756_s23, 256 }
  0x56   : > { %1195 = vmatpush1.bf16.msra.mxu0 %v1194_v14  ;;  %v293_v29 = vrot.slane %v1706_v24, 1  ;;  %v294_v30 = vrot.slane %v1708_v25, 1  ;;  %v261_v35 = vld [vmem:[#allocation2 + $0x28] sm:$0xff]  ;;  %v263_v36 = vld [vmem:[#allocation2 + $0x38] sm:$0xff]  ;;  %v260_v39 = vld [vmem:[#allocation2 + $0x20] sm:$0xff]  ;;  %v296_v41 = vrot.slane %v1712_v34, 1  ;;  %p1469_p10 = scmp.ne.s32.totalorder %s1756_s23, %s1468_s22 }
  0x57   : > { %1197 = vmatprep.subr.bf16.mxu0 %v1196_v15  ;;  %v262_v40 = vld [vmem:[#allocation2 + $0x30] sm:$0xff]  ;;  %v1208_v42 = vpack.c.bf16 %v263_v36, %v261_v35  ;;  %v265_v43 = vld [vmem:[#allocation2 + $0x48] sm:$0xff]  ;;  %v598_v44 = vld [vmem:[#allocation5] sm:$0xff]  ;;  %p1823_p1 = scmp.ne.s32.totalorder %s1814_s28, 0  ;;  %s1547_s10 = smov [#allocation7]  }
  0x58   : > { %v295_v37 = vsel %vm292_vm0, %v293_v29, %v294_v30  ;;  %v599_v45 = vld [vmem:[#allocation5 + $0x8] sm:$0xff]  ;;  %v267_v46 = vld [vmem:[#allocation2 + $0x58] sm:$0xff]  ;;  %v600_v48 = vld [vmem:[#allocation5 + $0x10] sm:$0xff]  ;;  %v1210_v51 = vpack.c.bf16 %v262_v40, %v260_v39  ;;  %v297_v52 = vsel %vm292_vm0, %v294_v30, %v296_v41  ;;  %v479_v40 = vrot.slane %v1706_v24, 2  ;;  %s1472_s9 = sshll.u32 %s1547_s10, 4  ;;  %s1473_s9 = int_to_ptr.vmem [resolvable:$false] %s1472_s9 }
  0x59   : > { %v1268_v47 = vpack.c.bf16 %v599_v45, %v598_v44  ;;  %v601_v49 = vld [vmem:[#allocation5 + $0x18] sm:$0xff]  ;;  %v602_v53 = vld [vmem:[#allocation5 + $0x20] sm:$0xff]  ;;  %v603_v54 = vld [vmem:[#allocation5 + $0x28] sm:$0xff]  ;;  %v1212_v55 = vpack.c.bf16 %v267_v46, %v265_v43  ;;  %v480_v41 = vrot.slane %v1708_v25, 2  ;;  %p1470_p2 = pnand %p1469_p10, %p1823_p1  ;;  %s1474_s11 = scalar_lea.vmem %s1473_s9, 512 }
  0x5a   : > { %1199 = vmatpush1.bf16.msra.mxu0 %v1198_v20  ;;  %v1272_v50 = vpack.c.bf16 %v601_v49, %v600_v48  ;;  %v264_v56 = vld [vmem:[#allocation2 + $0x40] sm:$0xff]  ;;  %v266_v57 = vld [vmem:[#allocation2 + $0x50] sm:$0xff]  ;;  %v269_v58 = vld [vmem:[#allocation2 + $0x68] sm:$0xff]  ;;  %v1276_v60 = vpack.c.bf16 %v603_v54, %v602_v53  ;;  %v571_v53 = vlaneseq  ;;  %p1475_p4 = scmp.lt.s32.totalorder %s1756_s23, %s1473_s9  ;;  %p1476_p7 = scmp.lt.s32.totalorder %s1474_s11, %s1468_s22 }
  0x5b   : > { %1201 = vmatprep.subr.bf16.mxu0 %v1200_v22  ;;  %1269 = vmatprep.subr.bf16.mxu1 %v1268_v47  ;;  %v271_v59 = vld [vmem:[#allocation2 + $0x78] sm:$0xff]  ;;  %v1214_v61 = vpack.c.bf16 %v266_v57, %v264_v56  ;;  %v604_v62 = vld [vmem:[#allocation5 + $0x30] sm:$0xff]  ;;  %v268_v2 = vld [vmem:[#allocation2 + $0x60] sm:$0xff]  ;;  %v481_v46 = vsel %vm478_vm2, %v479_v40, %v480_v41  ;;  %p1471_p3 = pneg %p1470_p2 }
  0x5c   : > { %1271 = vmatpush3.bf16.msra.mxu1 %v1268_v47  ;;  %v605_v63 = vld [vmem:[#allocation5 + $0x38] sm:$0xff]  ;;  %v1216_v1 = vpack.c.bf16 %v271_v59, %v269_v58  ;;  %v270_v3 = vld [vmem:[#allocation2 + $0x70] sm:$0xff]  ;;  %v463_v4 = vld [vmem:[#allocation2 + $0x108] sm:$0xff]  ;;  %v482_v47 = vrot.slane %v1712_v34, 2  ;;  %v572_v54 = vshrl.u32 %v571_v53, 7  ;;  %p1477_p8 = por %p1476_p7, %p1475_p4 }
  0x5d   : > { %1273 = vmatprep.subr.bf16.mxu1 %v1272_v50  ;;  %v465_v5 = vld [vmem:[#allocation2 + $0x118] sm:$0xff]  ;;  %v1280_v6 = vpack.c.bf16 %v605_v63, %v604_v62  ;;  %v1218_v7 = vpack.c.bf16 %v270_v3, %v268_v2  ;;  %v606_v8 = vld [vmem:[#allocation5 + $0x40] sm:$0xff]  ;;  %v607_v9 = vld [vmem:[#allocation5 + $0x48] sm:$0xff] }
  0x5e   : > { %1203 = vmatpush1.bf16.msra.mxu0 %v1202_v28  ;;  %v1220_v10 = vpack.c.bf16 %v465_v5, %v463_v4  ;;  %v462_v11 = vld [vmem:[#allocation2 + $0x100] sm:$0xff]  ;;  %v464_v12 = vld [vmem:[#allocation2 + $0x110] sm:$0xff]  ;;  %v467_v13 = vld [vmem:[#allocation2 + $0x128] sm:$0xff]  ;;  %v1284_v15 = vpack.c.bf16 %v607_v9, %v606_v8  ;;  %v577_v58 = vsub.s32 1, %v572_v54  ;;  %p1478_p11 = pnand %p1477_p8, %p1471_p3 }
  0x5f   : > { %1205 = vmatprep.subr.bf16.mxu0 %v1204_v31  ;;  %v469_v14 = vld [vmem:[#allocation2 + $0x138] sm:$0xff]  ;;  %v1222_v16 = vpack.c.bf16 %v464_v12, %v462_v11  ;;  %v608_v17 = vld [vmem:[#allocation5 + $0x50] sm:$0xff]  ;;  %v466_v20 = vld [vmem:[#allocation2 + $0x120] sm:$0xff] }
  0x60   : > { %1275 = vmatpush3.bf16.msra.mxu1 %v1272_v50  ;;  %v609_v18 = vld [vmem:[#allocation5 + $0x58] sm:$0xff]  ;;  %v1224_v19 = vpack.c.bf16 %v469_v14, %v467_v13  ;;  %v468_v21 = vld [vmem:[#allocation2 + $0x130] sm:$0xff]  ;;  %v471_v22 = vld [vmem:[#allocation2 + $0x148] sm:$0xff] }
  0x61   : > { %1014 = vmatmul.mubr.msk.f32.vlgmr.msra.gmra.mrb[0].mxu0 %vm298_vm1, %v295_v37  ;;  %1277 = vmatprep.subr.bf16.mxu1 %v1276_v60  ;;  %v473_v23 = vld [vmem:[#allocation2 + $0x158] sm:$0xff]  ;;  %v1288_v26 = vpack.c.bf16 %v609_v18, %v608_v17  ;;  %v1226_v27 = vpack.c.bf16 %v468_v21, %v466_v20  ;;  %v470_v29 = vld [vmem:[#allocation2 + $0x140] sm:$0xff]  ;;  %v472_v30 = vld [vmem:[#allocation2 + $0x150] sm:$0xff] }
  0x62   : > { %1207 = vmatpush1.bf16.msra.mxu0 %v1206_v38  ;;  %373 = vmatprep.mubr.f32.mxu0 %v1546_v0  ;;  %v1228_v28 = vpack.c.bf16 %v473_v23, %v471_v22  ;;  %v475_v31 = vld [vmem:[#allocation2 + $0x168] sm:$0xff]  ;;  %v477_v32 = vld [vmem:[#allocation2 + $0x178] sm:$0xff]  ;;  %v1230_v33 = vpack.c.bf16 %v472_v30, %v470_v29  ;;  %v474_v36 = vld [vmem:[#allocation2 + $0x160] sm:$0xff] }
  0x63   : > { %1209 = vmatprep.subr.bf16.mxu0 %v1208_v42  ;;  %v1232_v35 = vpack.c.bf16 %v477_v32, %v475_v31  ;;  %v476_v37 = vld [vmem:[#allocation2 + $0x170] sm:$0xff]  ;;  %v615_v38 = vld [vmem:[#allocation5 + $0x80] sm:$0xff]  ;;  %v616_v39 = vld [vmem:[#allocation5 + $0x88] sm:$0xff] }
  0x64   : > { %1279 = vmatpush3.bf16.msra.mxu1 %v1276_v60  ;;  %v1234_v42 = vpack.c.bf16 %v476_v37, %v474_v36  ;;  %v1236_v43 = vpack.c.bf16 %v616_v39, %v615_v38  ;;  %v617_v44 = vld [vmem:[#allocation5 + $0x90] sm:$0xff]  ;;  %v618_v45 = vld [vmem:[#allocation5 + $0x98] sm:$0xff]  ;;  %v619_v49 = vld [vmem:[#allocation5 + $0xa0] sm:$0xff] }
  0x65   : > { %1015 = vmatmul.mubr.msk.f32.gmra.mrb[2].mxu0 %vm298_vm1, %v297_v52  ;;  %1281 = vmatprep.subr.bf16.mxu1 %v1280_v6  ;;  %v1240_v48 = vpack.c.bf16 %v618_v45, %v617_v44  ;;  %v620_v50 = vld [vmem:[#allocation5 + $0xa8] sm:$0xff]  ;;  %v622_v52 = vld [vmem:[#allocation5 + $0xb8] sm:$0xff]  ;;  %v610_v60 = vld [vmem:[#allocation5 + $0x60] sm:$0xff] }
  0x66   : > { %1211 = vmatpush1.bf16.msra.mxu0 %v1210_v51  ;;  %448 = vmatprep.mubr.f32.mxu0 %v1546_v0  ;;  %v621_v51 = vld [vmem:[#allocation5 + $0xb0] sm:$0xff]  ;;  %v624_v56 = vld [vmem:[#allocation5 + $0xc8] sm:$0xff]  ;;  %v613_v4 = vld [vmem:[#allocation5 + $0x78] sm:$0xff] }
  0x67   : > { %1213 = vmatprep.subr.bf16.mxu0 %v1212_v55  ;;  %v1248_v34 = vpack.c.bf16 %v622_v52, %v621_v51  ;;  %v623_v55 = vld [vmem:[#allocation5 + $0xc0] sm:$0xff]  ;;  %v625_v63 = vld [vmem:[#allocation5 + $0xd0] sm:$0xff]  ;;  %v630_v13 = vld [vmem:[#allocation5 + $0xf8] sm:$0xff] }
  0x68   : > { %1283 = vmatpush3.bf16.msra.mxu1 %v1280_v6  ;;  %v1252_v57 = vpack.c.bf16 %v624_v56, %v623_v55  ;;  %v612_v3 = vld [vmem:[#allocation5 + $0x70] sm:$0xff]  ;;  %v627_v6 = vld [vmem:[#allocation5 + $0xe0] sm:$0xff]  ;;  %vm1020_vm4 = vmneg %vm589_vm3 }
  0x69   : > { %1285 = vmatprep.subr.bf16.mxu1 %v1284_v15  ;;  %v1296_v5 = vpack.c.bf16 %v613_v4, %v612_v3  ;;  %v791_v9 = vld [vmem:[#allocation5 + $0x100] sm:$0xff]  ;;  %v629_v12 = vld [vmem:[#allocation5 + $0xf0] sm:$0xff]  ;;  %v794_v31 = vld [vmem:[#allocation5 + $0x118] sm:$0xff] }
  0x6a   : > { %1215 = vmatpush1.bf16.msra.mxu0 %v1214_v61  ;;  %v611_v61 = vld [vmem:[#allocation5 + $0x68] sm:$0xff]  ;;  %v1264_v14 = vpack.c.bf16 %v630_v13, %v629_v12  ;;  %v793_v30 = vld [vmem:[#allocation5 + $0x110] sm:$0xff]  ;;  %v795_v36 = vld [vmem:[#allocation5 + $0x120] sm:$0xff] }
  0x6b   : > { %1217 = vmatprep.subr.bf16.mxu0 %v1216_v1  ;;  %v1292_v62 = vpack.c.bf16 %v611_v61, %v610_v60  ;;  %v626_v1 = vld [vmem:[#allocation5 + $0xd8] sm:$0xff]  ;;  %v796_v37 = vld [vmem:[#allocation5 + $0x128] sm:$0xff]  ;;  %v799_v52 = vld [vmem:[#allocation5 + $0x140] sm:$0xff] }
  0x6c   : > { %1287 = vmatpush3.bf16.msra.mxu1 %v1284_v15  ;;  %v1256_v2 = vpack.c.bf16 %v626_v1, %v625_v63  ;;  %v573_v15 = vsub.s32 0, %v572_v54  ;;  %v801_v54 = vld [vmem:[#allocation5 + $0x150] sm:$0xff]  ;;  %v802_v55 = vld [vmem:[#allocation5 + $0x158] sm:$0xff] }
  0x6d   : > { %1289 = vmatprep.subr.bf16.mxu1 %v1288_v26  ;;  %v1320_v56 = vpack.c.bf16 %v802_v55, %v801_v54  ;;  %v806_v60 = vld [vmem:[#allocation5 + $0x178] sm:$0xff] }
  0x6e   : > { %1219 = vmatpush1.bf16.msra.mxu0 %v1218_v7  ;;  %v628_v7 = vld [vmem:[#allocation5 + $0xe8] sm:$0xff] }
  0x6f   : > { %1221 = vmatprep.subr.bf16.mxu0 %v1220_v10  ;;  %v1260_v8 = vpack.c.bf16 %v628_v7, %v627_v6  ;;  %v792_v10 = vld [vmem:[#allocation5 + $0x108] sm:$0xff] }
  0x70   : > { %1291 = vmatpush3.bf16.msra.mxu1 %v1288_v26  ;;  %v1300_v11 = vpack.c.bf16 %v792_v10, %v791_v9 }
  0x71   : > { %1016 = vmatmul.mubr.msk.f32.vlgmr.msra.gmra.mrb[0].mxu0 %vm298_vm1, %v1706_v24  ;;  %v483_v24 = vsel %vm478_vm2, %v480_v41, %v482_v47  ;;  %1293 = vmatprep.subr.bf16.mxu1 %v1292_v62 }
  0x72   : > { %1223 = vmatpush1.bf16.msra.mxu0 %v1222_v16  ;;  %454 = vmatprep.mubr.f32.mxu0 %v1546_v0 }
  0x73   : > { %1225 = vmatprep.subr.bf16.mxu0 %v1224_v19 }
  0x74   : > { %1295 = vmatpush3.bf16.msra.mxu1 %v1292_v62 }
  0x75   : > { %1017 = vmatmul.mubr.msk.f32.gmra.mrb[2].mxu0 %vm298_vm1, %v1708_v25  ;;  %v1244_v25 = vpack.c.bf16 %v620_v50, %v619_v49  ;;  %1297 = vmatprep.subr.bf16.mxu1 %v1296_v5 }
  0x76   : > { %1227 = vmatpush1.bf16.msra.mxu0 %v1226_v27  ;;  %552 = vmatprep.mubr.f32.mxu0 %v1546_v0 }
  0x77   : > { %1229 = vmatprep.subr.bf16.mxu0 %v1228_v28 }
  0x78   : > { %1299 = vmatpush3.bf16.msra.mxu1 %v1296_v5 }
  0x79   : > { %1301 = vmatprep.subr.bf16.mxu1 %v1300_v11 }
  0x7a   : > { %1231 = vmatpush1.bf16.msra.mxu0 %v1230_v33 }
  0x7b   : > { %1233 = vmatprep.subr.bf16.mxu0 %v1232_v35  ;;  %v1304_v35 = vpack.c.bf16 %v794_v31, %v793_v30 }
  0x7e   : > { %1235 = vmatpush1.bf16.msra.mxu0 %v1234_v42 }
  0x7f   : > { %1237 = vmatprep.subr.bf16.mxu0 %v1236_v43 }
  0x81   : > { %1018 = vmatmul.mubr.msk.f32.vlgmr.msra.gmra.mrb[0].mxu0 %vm298_vm1, %v481_v46  ;;  %v1308_v46 = vpack.c.bf16 %v796_v37, %v795_v36 }
  0x82   : > { %558 = vmatprep.mubr.f32.mxu0 %v1546_v0  ;;  %1239 = vmatpush3.bf16.msra.mxu0 %v1236_v43  ;;  %v569_v0 = vld [vmem:[%s1807_s2] sm:$0x3] }
  0x83   : > { %1241 = vmatprep.subr.bf16.mxu0 %v1240_v48  ;;  %v578_v59 = vrot.slane %v569_v0, %v577_v58  ;;  %v574_v16 = vrot.slane %v569_v0, %v573_v15  ;;  %v803_v0 = vld [vmem:[#allocation5 + $0x160] sm:$0xff] }
  0x85   : > { %1019 = vmatmul.mubr.msk.f32.gmra.mrb[2].mxu0 %vm298_vm1, %v483_v24  ;;  %v797_v24 = vld [vmem:[#allocation5 + $0x130] sm:$0xff] }
  0x86   : > { %1243 = vmatpush3.bf16.msra.mxu0 %v1240_v48 }
  0x87   : > { %1245 = vmatprep.subr.bf16.mxu0 %v1244_v25 }
  0x8a   : > { %1247 = vmatpush3.bf16.msra.mxu0 %v1244_v25  ;;  %v798_v25 = vld [vmem:[#allocation5 + $0x138] sm:$0xff] }
  0x8b   : > { %1249 = vmatprep.subr.bf16.mxu0 %v1248_v34  ;;  %v1312_v51 = vpack.c.bf16 %v798_v25, %v797_v24 }
  0x8e   : > { %1251 = vmatpush3.bf16.msra.mxu0 %v1248_v34  ;;  %v800_v34 = vld [vmem:[#allocation5 + $0x148] sm:$0xff] }
  0x8f   : > { %1253 = vmatprep.subr.bf16.mxu0 %v1252_v57  ;;  %v1316_v53 = vpack.c.bf16 %v800_v34, %v799_v52 }
  0x92   : > { %1255 = vmatpush3.bf16.msra.mxu0 %v1252_v57  ;;  %v804_v57 = vld [vmem:[#allocation5 + $0x168] sm:$0xff] }
  0x93   : > { %1257 = vmatprep.subr.bf16.mxu0 %v1256_v2  ;;  %v1324_v58 = vpack.c.bf16 %v804_v57, %v803_v0 }
  0x96   : > { %1259 = vmatpush3.bf16.msra.mxu0 %v1256_v2  ;;  %v1022_v2 = vld [vmem:[%s1809_s4] ss:$0 sm:$0xff] }
  0x97   : > { %1261 = vmatprep.subr.bf16.mxu0 %v1260_v8 }
  0x9a   : > { %1263 = vmatpush3.bf16.msra.mxu0 %v1260_v8 }
  0x9b   : > { %1265 = vmatprep.subr.bf16.mxu0 %v1264_v14 }
  0x9e   : > { %1267 = vmatpush3.bf16.msra.mxu0 %v1264_v14 }
 0x154   : > { %v554_v17 = vpop.f32.mrb[0].mxu0 }
 0x155   : > { %v581_v18 = vadd.f32 %v574_v16, %v554_v17  ;;  %v556_v19 = vpop.f32.mrb[1].mxu0 }
 0x156   : > { %v1738_v20 = vadd.f32 %v578_v59, %v556_v19 }
 0x157   : > { %v585_v21 = vmax.f32 %v581_v18, 0.0 }
 0x158   : > { %v560_v22 = vpop.f32.mrb[2].mxu0 }
 0x159   : > { %v590_v23 = vrot.slane %v585_v21, 7  ;;  %v583_v26 = vadd.f32 %v574_v16, %v560_v22  ;;  %v562_v27 = vpop.f32.mrb[3].mxu0 }
 0x15a   : > { %v1741_v28 = vadd.f32 %v578_v59, %v562_v27  ;;  %v805_v59 = vld [vmem:[#allocation5 + $0x170] sm:$0xff] }
 0x15b   : > { %v586_v29 = vmax.f32 %v583_v26, 0.0  ;;  %1150 = vmatprep.mubr.msk.f32.mxu1 %vm1020_vm4, %v590_v23  ;;  %v596_v32 = vsel %vm589_vm3, 0.0, %v590_v23  ;;  %v1328_v61 = vpack.c.bf16 %v806_v60, %v805_v59 }
 0x15c   : > { %v633_v40 = vrot.slane %v596_v32, 1  ;;  %v807_v41 = vrot.slane %v596_v32, 2 }
 0x15d   : > { %v591_v33 = vrot.slane %v586_v29, 7 }
 0x15f   : > { %v597_v38 = vsel %vm589_vm3, %v591_v33, 0.0  ;;  %v592_v39 = vsel %vm589_vm3, %v590_v23, %v591_v33 }
 0x160   : > { %v636_v42 = vrot.slane %v597_v38, 1  ;;  %v810_v43 = vrot.slane %v597_v38, 2  ;;  %v634_v44 = vrot.slane %v592_v39, 1  ;;  %1151 = vmatmul.mubr.f32.vlgmr.msra.gmra.mrb[0].mxu1 %v592_v39  ;;  %v808_v45 = vrot.slane %v592_v39, 2 }
 0x161   : > { %1303 = vmatpush3.bf16.msra.mxu1 %v1300_v11 }
 0x162   : > { %v635_v47 = vsel %vm292_vm0, %v633_v40, %v634_v44  ;;  %1305 = vmatprep.subr.bf16.mxu1 %v1304_v35  ;;  %v809_v48 = vsel %vm478_vm2, %v807_v41, %v808_v45  ;;  %v637_v49 = vsel %vm292_vm0, %v634_v44, %v636_v42  ;;  %v811_v50 = vsel %vm478_vm2, %v808_v45, %v810_v43 }
 0x163   : > { %1115 = vmatprep.mubr.f32.mxu0 %v635_v47  ;;  %1185 = vmatprep.mubr.f32.mxu1 %v809_v48 }
 0x164   : > { %1116 = vmatmul.mubr.f32.vlgmr.msra.gmra.mrb[4].mxu0 %v637_v49 }
 0x165   : > { %1307 = vmatpush3.bf16.msra.mxu1 %v1304_v35 }
 0x166   : > { %1309 = vmatprep.subr.bf16.mxu1 %v1308_v46 }
 0x169   : > { %1311 = vmatpush3.bf16.msra.mxu1 %v1308_v46 }
 0x16a   : > { %1313 = vmatprep.subr.bf16.mxu1 %v1312_v51 }
 0x16d   : > { %1315 = vmatpush3.bf16.msra.mxu1 %v1312_v51 }
 0x16e   : > { %1317 = vmatprep.subr.bf16.mxu1 %v1316_v53 }
 0x171   : > { %1319 = vmatpush3.bf16.msra.mxu1 %v1316_v53 }
 0x172   : > { %1321 = vmatprep.subr.bf16.mxu1 %v1320_v56 }
 0x175   : > { %1323 = vmatpush3.bf16.msra.mxu1 %v1320_v56 }
 0x176   : > { %1325 = vmatprep.subr.bf16.mxu1 %v1324_v58 }
 0x179   : > { %1327 = vmatpush3.bf16.msra.mxu1 %v1324_v58 }
 0x17a   : > { %1329 = vmatprep.subr.bf16.mxu1 %v1328_v61 }
 0x17d   : > { %1331 = vmatpush3.bf16.msra.mxu1 %v1328_v61 }
 0x180   : > { %1186 = vmatmul.mubr.f32.vlgmr.msra.gmra.mrb[0].mxu1 %v811_v50 }
 0x237   : > { %v1117_v62 = vpop.f32.mrb[4].mxu0 }
 0x238   : > { %v706_v63 = vpop.f32.mrb[5].mxu0 }
 0x253   : > { %v1187_v1 = vpop.f32.mrb[0].mxu1 }
 0x254   : > { %v1332_v3 = vadd.f32 %v1187_v1, %v1117_v62  ;;  %v880_v4 = vpop.f32.mrb[1].mxu1 }
 0x255   : > { %v1333_v5 = vadd.f32 %v880_v4, %v706_v63 }
 0x256   : > { %v899_v6 = vadd.f32 %v1332_v3, %v1022_v2 }
 0x257   : > { %v898_v7 = vadd.f32 %v1333_v5, %v1022_v2 }
 0x258   : > { %v901_v8 = vmax.f32 %v899_v6, 0.0 }
 0x259   : > { %v900_v9 = vmax.f32 %v898_v7, 0.0 }
 0x25a   : > { %v903_v10 = vadd.f32 %v901_v8, %v1741_v28 }
 0x25b   : > { %v902_v11 = vadd.f32 %v900_v9, %v1738_v20 }
 0x25c   : > { %905 = vst [vmem:[%s247_s7 + $0x8] sm:$0xff] %v903_v10 }
 0x25d   : > { %904 = vst [vmem:[%s247_s7] sm:$0xff] %v902_v11 }
 0x25e   : > { %1481 = shalt.err (!%p1478_p11)
}
 0x25f   : > { %s1482_s12 = scalar_lea.hbm %s1761_s30, 256  ;;  %s1486_s15 = scalar_lea.hbm %s1810_s5, 512 }
 0x260   : > { %p1483_p13 = scmp.ne.s32.totalorder %s1761_s30, %s1482_s12  ;;  %p1487_p6 = scmp.lt.u32.totalorder %s1761_s30, %s1810_s5 }
 0x261   : > { %p1488_p9 = scmp.lt.u32.totalorder %s1486_s15, %s1482_s12  ;;  %p1490_p10 = scmp.lt.u32.totalorder %s1482_s12, %s1761_s30 }
 0x262   : > { %p1484_p0 = pnand %p1483_p13, %p1823_p1 }
 0x263   : > { %p1489_p12 = por %p1488_p9, %p1487_p6 }
 0x264   : > { %p1485_p5 = pneg %p1484_p0 }
 0x265   : > { %p1491_p2 = por %p1490_p10, %p1489_p12 }
 0x267   : > { %p1492_p3 = pnand %p1491_p2, %p1485_p5 }
 0x269   : > { %1495 = shalt.err (!%p1492_p3)
}
 0x26a   : > { %s1548_s7 = smov 128   ;;  %s1549_s25 = smov 8  }
 0x26b   : > { %1353 = dma.vmem_to_hbm [thread:$0]  (%p1823_p1), %s1756_s23, 256, %s1761_s30, %s1764_s8, %s1548_s7, %s1548_s7, %s1549_s25  }
 0x26c PF: > { %p1370_p4 = scmp.ge.s32.totalorder %s1538_s21, 2  ;;  %s935_s26 = sand.u32 1, %s1526_s18  }
 0x26d   : > { %p1824_p7 = scmp.ne.s32.totalorder %s1815_s29, 0  ;;  %s936_s6 = scalar_lea.sflag [#allocation4], %s935_s26 }
 0x26f   : > { %p1363_p8 = pnand %p1370_p4, %p1824_p7 }
 0x271   : > { %1521 = dma.done.wait (!%p1363_p8), %s936_s6, 256  }
 0x272   : > { %1523 = vsyncadd (!%p1363_p8), %s936_s6, 4294967040  ;;  %p17_p11 = scmp.ge.s32.totalorder %s1605_s24, 4   ;;  %s1825_s18 = smov %s1530_s19 }
 0x273   : > { %s1826_s19 = smov %s1534_s20  ;;  %s1827_s20 = smov %s1616_s27 }
 0x274   : > { %s1828_s21 = smov %s1605_s24  ;;  %19 = sbr.rel (!%p17_p11) target bundleno = 5 (0x5), region = 88 }
 0x27b   :  { %941 = vsyncpa [#allocation3], 1 }
 0x27c   :  { %943 = vsyncpa [#allocation3 + $0x1], 1 }
 0x27d   :  { %944 = vsyncpa [#allocation6], 1 }
 0x27e   :  { %945 = vsyncpa [#allocation4], 1 }
 0x27f   :  { %947 = vsyncpa [#allocation4 + $0x1], 1 }

</bundles_post_ra>
